<compile_context>
chip_gen: v5e
topology: v5e:2x2
jax: 0.10.0
libtpu: 0.0.40
codegen_flags: <defaults>
</compile_context>

<pallas_src>
import jax
import jax.numpy as jnp
from jax import lax
from jax.experimental import pallas as pl
from jax.experimental.pallas import tpu as pltpu

_NEG_BIG = -1e30  # bias of padded vocab rows -> exp() underflows to exactly 0


def _make_kernel(tile_v, exp_dtype):
    """Online-softmax NCE scoring kernel over vocab chunks.

    Grid: (row_tiles [parallel], vocab_tiles [arbitrary, last/innermost]).

    ctx_ref : (D+1, TN) bf16  transposed context rows + a trailing ones row
    w_ref   : (TV, D+1) bf16  vocab chunk of W with the bias folded in as the
                              last column (padded rows carry bias = -1e30)
    ids_ref : (1, TN)  int32  next-word ids for this row tile (lane dense)
    out_ref : (1, TN)  f32    gathered softmax probabilities (lane dense)
    m_sc/l_sc/t_sc : (1, TN) f32 running max / denominator / target exp
    """

    def kernel(ctx_ref, w_ref, ids_ref, out_ref, m_sc, l_sc, t_sc):
        v = pl.program_id(1)

        @pl.when(v == 0)
        def _():
            m_sc[...] = jnp.full_like(m_sc, -jnp.inf)
            l_sc[...] = jnp.zeros_like(l_sc)
            t_sc[...] = jnp.zeros_like(t_sc)

        # logits[r, n] = sum_d W_aug[v*TV + r, d] * ctx_aug[d, n]
        # (MXU, bf16 inputs, f32 accumulation; bias is the folded last column)
        logits = jnp.dot(w_ref[...], ctx_ref[...],
                         preferred_element_type=jnp.float32)        # (TV, TN)

        # Online softmax update over this vocab chunk.
        m_prev = m_sc[...]                                           # (1, TN)
        m_new = jnp.maximum(m_prev, jnp.max(logits, axis=0, keepdims=True))
        alpha = jnp.exp(m_prev - m_new)         # exp(-inf)=0 at the first step

        # exp in bf16 on v6e/v7x (EUP bf16 path); f32 elsewhere. Accumulate f32.
        e = jnp.exp((logits - m_new).astype(exp_dtype)).astype(jnp.float32)

        l_sc[...] = alpha * l_sc[...] + jnp.sum(e, axis=0, keepdims=True)

        # Gather the target's exp(logit - m) from this chunk only (iota offset
        # by the chunk's first vocab row); padded rows never match a clamped id.
        vocab_idx = v * tile_v + lax.broadcasted_iota(jnp.int32, e.shape, 0)
        hit = vocab_idx == ids_ref[...]                              # (TV, TN)
        t_sc[...] = alpha * t_sc[...] + jnp.sum(
            jnp.where(hit, e, 0.0), axis=0, keepdims=True)

        m_sc[...] = m_new

        @pl.when(v == pl.num_programs(1) - 1)
        def _():
            # Exact divide on a (1, TN) vector: negligible cost, no approx error.
            out_ref[...] = t_sc[...] / l_sc[...]

    return kernel


def _device_kind():
    try:
        return jax.devices()[0].device_kind.lower()
    except Exception:  # pragma: no cover - CPU/interpret fallback
        return ""


def _round_up(x, m):
    return ((x + m - 1) // m) * m


def nce_next_word_prob(context, next_w, W, b, *, tile_n=None, tile_v=None):
    """context: (n_samples, n_steps, D); next_w: (n_samples, n_steps) int;
    W: (V, D); b: (V,).  Returns (n_samples, n_steps) f32 probabilities of the
    next word under logits = context @ W.T + b (softmax over the vocab)."""
    n_samples, n_steps, input_dim = context.shape
    vocab_size = W.shape[0]
    N = n_samples * n_steps

    # ---- generation-conditional knobs (v5e/v6e: 128 MiB VMEM, no bf16 EUP on
    # v5e; v7x: 64 MiB VMEM per TC, 2 TCs) ---------------------------------
    kind = _device_kind()
    is_v5 = "v5" in kind
    is_v6 = "v6" in kind
    is_v7 = ("v7" in kind) or ("7x" in kind)
    if tile_n is None:
        tile_n = 512 if (is_v5 or is_v6) else 256
    if tile_v is None:
        tile_v = 512
    exp_dtype = jnp.bfloat16 if (is_v6 or is_v7) else jnp.float32
    if is_v5 or is_v6:
        vmem_limit = 100 * 1024 * 1024
    elif is_v7:
        vmem_limit = 48 * 1024 * 1024
    else:
        vmem_limit = 64 * 1024 * 1024

    # ---- tile sizing / padding (no divisibility asserts) ------------------
    tile_n = min(tile_n, _round_up(N, 128))          # lane axis, mult. of 128
    tile_v = min(tile_v, _round_up(vocab_size, 8))   # sublane axis, mult. of 8
    n_tiles_n = pl.cdiv(N, tile_n)
    n_tiles_v = pl.cdiv(vocab_size, tile_v)
    n_pad = n_tiles_n * tile_n
    v_pad = n_tiles_v * tile_v
    d_aug = input_dim + 1                            # bias folded into matmul

    # ---- lane-dense context: rows on lanes, features on sublanes ----------
    ctx_t = jnp.swapaxes(context.reshape(N, input_dim).astype(jnp.float32),
                         0, 1)                                       # (D, N)
    ctx_aug = jnp.concatenate([ctx_t, jnp.ones((1, N), jnp.float32)], axis=0)
    if n_pad != N:
        ctx_aug = jnp.pad(ctx_aug, ((0, 0), (0, n_pad - N)))
    ctx_aug = ctx_aug.astype(jnp.bfloat16)                           # (D+1, Np)

    # ---- W with bias folded in; padded vocab rows get a -1e30 bias --------
    w_aug = jnp.concatenate(
        [W.astype(jnp.float32),
         b.reshape(vocab_size, 1).astype(jnp.float32)], axis=1)      # (V, D+1)
    if v_pad != vocab_size:
        pad_rows = jnp.concatenate(
            [jnp.zeros((v_pad - vocab_size, input_dim), jnp.float32),
             jnp.full((v_pad - vocab_size, 1), _NEG_BIG, jnp.float32)], axis=1)
        w_aug = jnp.concatenate([w_aug, pad_rows], axis=0)
    w_aug = w_aug.astype(jnp.bfloat16)                               # (Vp, D+1)

    # ---- ids, clamped to [0, V) (matches take_along_axis clipping) --------
    ids = jnp.clip(next_w.reshape(N).astype(jnp.int32), 0, vocab_size - 1)
    if n_pad != N:
        ids = jnp.pad(ids, (0, n_pad - N))
    ids2 = ids.reshape(1, n_pad)

    kernel = _make_kernel(tile_v, exp_dtype)
    out = pl.pallas_call(
        kernel,
        out_shape=jax.ShapeDtypeStruct((1, n_pad), jnp.float32),
        grid_spec=pltpu.PrefetchScalarGridSpec(
            num_scalar_prefetch=0,
            grid=(n_tiles_n, n_tiles_v),          # rows first, vocab last
            in_specs=[
                pl.BlockSpec((d_aug, tile_n), lambda i, v: (0, i)),   # ctx_aug
                pl.BlockSpec((tile_v, d_aug), lambda i, v: (v, 0)),   # W chunk
                pl.BlockSpec((1, tile_n), lambda i, v: (0, i)),       # ids
            ],
            out_specs=pl.BlockSpec((1, tile_n), lambda i, v: (0, i)),
            scratch_shapes=[pltpu.VMEM((1, tile_n), jnp.float32),     # m
                            pltpu.VMEM((1, tile_n), jnp.float32),     # l
                            pltpu.VMEM((1, tile_n), jnp.float32)],    # target_e
        ),
        compiler_params=pltpu.CompilerParams(
            dimension_semantics=("parallel", "arbitrary"),
            vmem_limit_bytes=vmem_limit,
        ),
    )(ctx_aug, w_aug, ids2)

    return out[0, :N].reshape(n_samples, n_steps)


if __name__ == "__main__":
    # Small shapes consistent with the module's forward:
    #   n_steps = 8, input_dim = 32, vocab_size = 128, n_samples = 2
    n_samples, n_steps, input_dim, vocab_size = 2, 8, 32, 128

    key = jax.random.PRNGKey(0)
    k_w, k_ctx, k_ids = jax.random.split(key, 3)

    # Deterministic xavier_uniform init for W (as in NCE.__init__); b = zeros.
    limit = jnp.sqrt(6.0 / (vocab_size + input_dim))
    W = jax.random.uniform(k_w, (vocab_size, input_dim), jnp.float32, -limit, limit)
    b = jnp.zeros((vocab_size,), jnp.float32)

    context = jax.random.normal(k_ctx, (n_samples, n_steps, input_dim), jnp.float32)
    next_w = jax.random.randint(k_ids, (n_samples, n_steps), 0, vocab_size, jnp.int32)

    # jit the wrapper so the transpose / bias-fold / cast / pad fuse into one
    # HBM pass before the kernel runs.
    fn = jax.jit(nce_next_word_prob)
    prob = jax.block_until_ready(fn(context, next_w, W, b))

    # Pure-JAX reference on the same bf16-rounded MXU inputs (f32 accumulation).
    ctx_f = context.astype(jnp.bfloat16).astype(jnp.float32)
    w_f = W.astype(jnp.bfloat16).astype(jnp.float32)
    b_f = b.astype(jnp.bfloat16).astype(jnp.float32)
    logits = jnp.einsum("std,vd->stv", ctx_f, w_f) + b_f
    ref = jnp.take_along_axis(jax.nn.softmax(logits, axis=-1),
                              next_w[..., None], axis=-1)[..., 0]

    assert prob.shape == (n_samples, n_steps)
    # Tolerance covers bf16 MXU inputs and (on v6e/v7x) the bf16 exp path.
    assert jnp.allclose(prob, ref, atol=2e-3, rtol=2e-2), (
        f"max abs err {jnp.max(jnp.abs(prob - ref))}")

    print("KERNEL_OK")
</pallas_src>

<mosaic_0001>
module attributes {stable_mosaic.version = 11 : i64} {
  func.func @kernel(%arg0: i32, %arg1: i32, %arg2: memref<33x128xbf16, #tpu.memory_space<vmem>>, %arg3: memref<128x33xbf16, #tpu.memory_space<vmem>>, %arg4: memref<1x128xi32, #tpu.memory_space<vmem>>, %arg5: memref<1x128xf32, #tpu.memory_space<vmem>>, %arg6: memref<1x128xf32, #tpu.memory_space<vmem>>, %arg7: memref<1x128xf32, #tpu.memory_space<vmem>>, %arg8: memref<1x128xf32, #tpu.memory_space<vmem>>) attributes {dimension_semantics = [#tpu.dimension_semantics<parallel>, #tpu.dimension_semantics<arbitrary>], iteration_bounds = array<i64: 1, 1>, scalar_prefetch = 0 : i64, scratch_operands = 3 : i64, tpu.core_type = #tpu.core_type<tc>, window_params = [{transform_indices = @transform_0, window_bounds = array<i64: 33, 128>}, {transform_indices = @transform_1, window_bounds = array<i64: 128, 33>}, {transform_indices = @transform_2, window_bounds = array<i64: 1, 128>}, {transform_indices = @transform_3, window_bounds = array<i64: 1, 128>}]} {
    %c0_i32 = arith.constant 0 : i32
    %0 = arith.cmpi eq, %arg1, %c0_i32 : i32
    %1 = arith.extui %0 : i1 to i32
    %c0_i32_0 = arith.constant 0 : i32
    %2 = arith.cmpi ne, %1, %c0_i32_0 : i32
    scf.if %2 {
      %cst_24 = arith.constant 0xFF800000 : f32
      %40 = vector.broadcast %cst_24 : f32 to vector<1x128xf32>
      %c0_25 = arith.constant 0 : index
      %c0_26 = arith.constant 0 : index
      %41 = vector.load %arg6[%c0_25, %c0_26] : memref<1x128xf32, #tpu.memory_space<vmem>>, vector<1x128xf32>
      tpu.vector_store %arg6[%c0_25, %c0_26], %40 {strides = array<i32>} : memref<1x128xf32, #tpu.memory_space<vmem>>, vector<1x128xf32>,
      %cst_27 = arith.constant 0.000000e+00 : f32
      %42 = vector.broadcast %cst_27 : f32 to vector<1x128xf32>
      %c0_28 = arith.constant 0 : index
      %c0_29 = arith.constant 0 : index
      %43 = vector.load %arg7[%c0_28, %c0_29] : memref<1x128xf32, #tpu.memory_space<vmem>>, vector<1x128xf32>
      tpu.vector_store %arg7[%c0_28, %c0_29], %42 {strides = array<i32>} : memref<1x128xf32, #tpu.memory_space<vmem>>, vector<1x128xf32>,
      %cst_30 = arith.constant 0.000000e+00 : f32
      %44 = vector.broadcast %cst_30 : f32 to vector<1x128xf32>
      %c0_31 = arith.constant 0 : index
      %c0_32 = arith.constant 0 : index
      %45 = vector.load %arg8[%c0_31, %c0_32] : memref<1x128xf32, #tpu.memory_space<vmem>>, vector<1x128xf32>
      tpu.vector_store %arg8[%c0_31, %c0_32], %44 {strides = array<i32>} : memref<1x128xf32, #tpu.memory_space<vmem>>, vector<1x128xf32>,
    } else {
    }
    %c0 = arith.constant 0 : index
    %c0_1 = arith.constant 0 : index
    %3 = vector.load %arg3[%c0, %c0_1] : memref<128x33xbf16, #tpu.memory_space<vmem>>, vector<128x33xbf16>
    %c0_2 = arith.constant 0 : index
    %c0_3 = arith.constant 0 : index
    %4 = vector.load %arg2[%c0_2, %c0_3] : memref<33x128xbf16, #tpu.memory_space<vmem>>, vector<33x128xbf16>
    %cst = arith.constant dense<0.000000e+00> : vector<128x128xf32>
    %5 = tpu.matmul %3, %4, %cst {dimension_numbers = #tpu.dot_dimension_numbers<[1], [0], [0], [1], [0, 0, 1, 1], [], []>} : vector<128x33xbf16>, vector<33x128xbf16>, vector<128x128xf32> -> vector<128x128xf32>
    %c0_4 = arith.constant 0 : index
    %c0_5 = arith.constant 0 : index
    %6 = vector.load %arg6[%c0_4, %c0_5] : memref<1x128xf32, #tpu.memory_space<vmem>>, vector<1x128xf32>
    %cst_6 = arith.constant dense<0xFF800000> : vector<128xf32>
    %7 = vector.multi_reduction <maximumf>, %5, %cst_6 [0] : vector<128x128xf32> to vector<128xf32>
    %8 = vector.shape_cast %7 : vector<128xf32> to vector<1x128xf32>
    %9 = arith.maximumf %6, %8 : vector<1x128xf32>
    %10 = arith.subf %6, %9 : vector<1x128xf32>
    %11 = math.exp %10 : vector<1x128xf32>
    %12 = vector.broadcast %9 : vector<1x128xf32> to vector<128x128xf32>
    %13 = arith.subf %5, %12 : vector<128x128xf32>
    %14 = math.exp %13 : vector<128x128xf32>
    %c0_7 = arith.constant 0 : index
    %c0_8 = arith.constant 0 : index
    %15 = vector.load %arg7[%c0_7, %c0_8] : memref<1x128xf32, #tpu.memory_space<vmem>>, vector<1x128xf32>
    %16 = arith.mulf %11, %15 : vector<1x128xf32>
    %cst_9 = arith.constant dense<0.000000e+00> : vector<128xf32>
    %17 = vector.multi_reduction <add>, %14, %cst_9 [0] : vector<128x128xf32> to vector<128xf32>
    %18 = vector.shape_cast %17 : vector<128xf32> to vector<1x128xf32>
    %19 = arith.addf %16, %18 : vector<1x128xf32>
    %c0_10 = arith.constant 0 : index
    %c0_11 = arith.constant 0 : index
    %20 = vector.load %arg7[%c0_10, %c0_11] : memref<1x128xf32, #tpu.memory_space<vmem>>, vector<1x128xf32>
    tpu.vector_store %arg7[%c0_10, %c0_11], %19 {strides = array<i32>} : memref<1x128xf32, #tpu.memory_space<vmem>>, vector<1x128xf32>,
    %c128_i32 = arith.constant 128 : i32
    %21 = arith.muli %arg1, %c128_i32 : i32
    %22 = tpu.iota {dimensions = array<i32: 0>} : vector<128x128xi32>
    %23 = vector.broadcast %21 : i32 to vector<128x128xi32>
    %24 = arith.addi %23, %22 : vector<128x128xi32>
    %c0_12 = arith.constant 0 : index
    %c0_13 = arith.constant 0 : index
    %25 = vector.load %arg4[%c0_12, %c0_13] : memref<1x128xi32, #tpu.memory_space<vmem>>, vector<1x128xi32>
    %26 = vector.broadcast %25 : vector<1x128xi32> to vector<128x128xi32>
    %27 = arith.cmpi eq, %24, %26 : vector<128x128xi32>
    %c0_14 = arith.constant 0 : index
    %c0_15 = arith.constant 0 : index
    %28 = vector.load %arg8[%c0_14, %c0_15] : memref<1x128xf32, #tpu.memory_space<vmem>>, vector<1x128xf32>
    %29 = arith.mulf %11, %28 : vector<1x128xf32>
    %cst_16 = arith.constant 0.000000e+00 : f32
    %30 = vector.broadcast %cst_16 : f32 to vector<128x128xf32>
    %31 = arith.select %27, %14, %30 : vector<128x128xi1>, vector<128x128xf32>
    %cst_17 = arith.constant dense<0.000000e+00> : vector<128xf32>
    %32 = vector.multi_reduction <add>, %31, %cst_17 [0] : vector<128x128xf32> to vector<128xf32>
    %33 = vector.shape_cast %32 : vector<128xf32> to vector<1x128xf32>
    %34 = arith.addf %29, %33 : vector<1x128xf32>
    %c0_18 = arith.constant 0 : index
    %c0_19 = arith.constant 0 : index
    %35 = vector.load %arg8[%c0_18, %c0_19] : memref<1x128xf32, #tpu.memory_space<vmem>>, vector<1x128xf32>
    tpu.vector_store %arg8[%c0_18, %c0_19], %34 {strides = array<i32>} : memref<1x128xf32, #tpu.memory_space<vmem>>, vector<1x128xf32>,
    %c0_20 = arith.constant 0 : index
    %c0_21 = arith.constant 0 : index
    %36 = vector.load %arg6[%c0_20, %c0_21] : memref<1x128xf32, #tpu.memory_space<vmem>>, vector<1x128xf32>
    tpu.vector_store %arg6[%c0_20, %c0_21], %9 {strides = array<i32>} : memref<1x128xf32, #tpu.memory_space<vmem>>, vector<1x128xf32>,
    %c0_i32_22 = arith.constant 0 : i32
    %37 = arith.cmpi eq, %arg1, %c0_i32_22 : i32
    %38 = arith.extui %37 : i1 to i32
    %c0_i32_23 = arith.constant 0 : i32
    %39 = arith.cmpi ne, %38, %c0_i32_23 : i32
    scf.if %39 {
      %c0_24 = arith.constant 0 : index
      %c0_25 = arith.constant 0 : index
      %40 = vector.load %arg8[%c0_24, %c0_25] : memref<1x128xf32, #tpu.memory_space<vmem>>, vector<1x128xf32>
      %c0_26 = arith.constant 0 : index
      %c0_27 = arith.constant 0 : index
      %41 = vector.load %arg7[%c0_26, %c0_27] : memref<1x128xf32, #tpu.memory_space<vmem>>, vector<1x128xf32>
      %42 = arith.divf %40, %41 : vector<1x128xf32>
      %c0_28 = arith.constant 0 : index
      %c0_29 = arith.constant 0 : index
      %43 = vector.load %arg5[%c0_28, %c0_29] : memref<1x128xf32, #tpu.memory_space<vmem>>, vector<1x128xf32>
      tpu.vector_store %arg5[%c0_28, %c0_29], %42 {strides = array<i32>} : memref<1x128xf32, #tpu.memory_space<vmem>>, vector<1x128xf32>,
    } else {
    }
    return
  }
  func.func @transform_0(%arg0: i32, %arg1: i32) -> (i32, i32) {
    %c0_i32 = arith.constant 0 : i32
    %c0_i32_0 = arith.constant 0 : i32
    return %c0_i32, %arg0 : i32, i32
  }
  func.func @transform_1(%arg0: i32, %arg1: i32) -> (i32, i32) {
    %c0_i32 = arith.constant 0 : i32
    %c0_i32_0 = arith.constant 0 : i32
    return %arg1, %c0_i32 : i32, i32
  }
  func.func @transform_2(%arg0: i32, %arg1: i32) -> (i32, i32) {
    %c0_i32 = arith.constant 0 : i32
    %c0_i32_0 = arith.constant 0 : i32
    return %c0_i32, %arg0 : i32, i32
  }
  func.func @transform_3(%arg0: i32, %arg1: i32) -> (i32, i32) {
    %c0_i32 = arith.constant 0 : i32
    %c0_i32_0 = arith.constant 0 : i32
    return %c0_i32, %arg0 : i32, i32
  }
}

</mosaic_0001>

<bundles_post_ra>
// kernel: squeeze.1
= control target key start
LH: loop header
LB: loop body
LE: loop exit
PB: predicated region body
PF: predicated region fallthrough
CT: control target
= control target key end

     0   :  { %s80_s0 = inlined_call_operand.vmem [shape: f32[16], index: 0, kind: input, shape index: {}]   ;;  %s81_s1 = inlined_call_operand.hbm [shape: f32[2,8], index: 1, kind: output, shape index: {}]  }
   0x1   :  { %v5_v0 = vld [vmem:[%s80_s0] sm:$0x1] }
   0x2   :  { %2 = vsyncpa [#allocation1], 0  ;;  %6 = vst [vmem:[#allocation3] sm:$0x1] %v5_v0  ;;  %vm8_vm0 = vcmask 64512   ;;  %s62_s0 = smov 120  }
   0x3   :  { %s63_s8 = smov [#allocation0]   ;;  %s27_s1 = sshll.u32 %s81_s1, 4  ;;  %s28_s1 = int_to_ptr.hbm [resolvable:$true] %s27_s1 }
   0x4   :  { %s25_s9 = sshll.u32 %s63_s8, 4  ;;  %s26_s9 = int_to_ptr.vmem [resolvable:$true] %s25_s9 }
   0x9   :  { %v10_v1 = vld [vmem:[#allocation3] sm:$0x1]  }
   0xa   :  { %v7_v2 = vld [vmem:[#allocation3] sm:$0x1]   ;;  %11 = vrot.lane.b32.xlu0 %v10_v1, %s62_s0 }
   0xb   :  { %9 = vst.msk [vmem:[#allocation2] sm:$0x1] %vm8_vm0, %v7_v2  }
  0x7c   :  { %v12_v3 = vpop.permute.xlu0 %11  }
  0x7d   :  { %15 = vst.msk [vmem:[#allocation2 + $0x1] sm:$0x1] %vm8_vm0, %v12_v3  }
  0x84   :  { %v18_v4 = vld [vmem:[#allocation2] sm:$0x3] }
  0x85   :  { %21 = vst [vmem:[#allocation0] sm:$0x3] %v18_v4 }
  0x86   :  { %30 = dma.vmem_to_hbm [thread:$0]  %s26_s9, 32, %s28_s1, [#allocation1]  }
  0x87   :  { %60 = dma.done.wait [#allocation1], 32  }
  0x88   :  { %61 = vsyncadd [#allocation1], 4294967264 }
  0x89   :  { %33 = vsyncpa [#allocation1], 1 }

// kernel: nce_next_word_prob.1
= control target key start
LH: loop header
LB: loop body
LE: loop exit
PB: predicated region body
PF: predicated region fallthrough
CT: control target
= control target key end

     0   :  { %vm123_vm0 = vcmask 1040384   ;;  %v507_v2 = vmov 0   ;;  %vm98_vm1 = vcmask 269312   ;;  %v508_v18 = vmov -inf   ;;  %s686_s0 = inlined_call_operand.vmem [shape: bf16[33,128], index: 0, kind: input, shape index: {}]   ;;  %s687_s1 = inlined_call_operand.vmem [shape: bf16[128,33], index: 1, kind: input, shape index: {}]   ;;  %s688_s2 = inlined_call_operand.vmem [shape: s32[1,128], index: 2, kind: input, shape index: {}]   ;;  %s689_s3 = inlined_call_operand.vmem [shape: f32[1,128], index: 3, kind: output, shape index: {}]  }
   0x1   :  { %v42_v0 = vld [vmem:[%s686_s0 + $0x10] sm:$0x1]  ;;  %v125_v3 = vsel %vm123_vm0, 65535, %v507_v2  ;;  %v457_v6 = vld [vmem:[%s686_s0 + $0x8] sm:$0xff]  ;;  %v456_v7 = vld [vmem:[%s686_s0] sm:$0xff]  ;;  %v509_v19 = vmov 0.0   ;;  %v281_v58 = vlaneseq }
   0x2   :  { %v92_v1 = vunpack.c.l.b16 %v42_v0  ;;  %v448_v8 = vld [vmem:[%s687_s1] sm:$0xff]  ;;  %v450_v9 = vld [vmem:[%s687_s1 + $0x10] sm:$0xff]  ;;  %v449_v12 = vld [vmem:[%s687_s1 + $0x8] sm:$0xff]  ;;  %19 = vst [vmem:[#allocation2] sm:$0x1] %v508_v18 }
   0x3   :  { %v452_v10 = vld [vmem:[%s687_s1 + $0x20] sm:$0xff]  ;;  %v454_v11 = vld [vmem:[%s687_s1 + $0x30] sm:$0xff]  ;;  %v451_v13 = vld [vmem:[%s687_s1 + $0x18] sm:$0xff]  ;;  %20 = vst [vmem:[#allocation3] sm:$0x1] %v509_v19  ;;  %v609_v0 = vshrl.u32 %v281_v58, 7 }
   0x4   :  { %v95_v4 = vpack.c.b16 %v92_v1, %v92_v1  ;;  %v453_v14 = vld [vmem:[%s687_s1 + $0x28] sm:$0xff]  ;;  %v455_v15 = vld [vmem:[%s687_s1 + $0x38] sm:$0xff]  ;;  %21 = vst [vmem:[#allocation4] sm:$0x1] %v509_v19 }
   0x6   :  { %v127_v5 = vand.u32 %v125_v3, %v95_v4 }
   0x8   :  { %134 = vmatpush.bf16.msra.mxu0 %v127_v5  ;;  %458 = vmatpush.bf16.msra.mxu1 %v127_v5 }
   0x9   :  { %459 = vmatpush.bf16.msra.mxu2 %v127_v5  ;;  %460 = vmatpush.bf16.msra.mxu3 %v127_v5  ;;  %v595_v54 = vld [vmem:[#allocation2] sm:$0x1] }
   0xc   :  { %135 = vmatpush.bf16.msra.mxu0 %v457_v6  ;;  %461 = vmatpush.bf16.msra.mxu1 %v457_v6 }
   0xd   :  { %462 = vmatpush.bf16.msra.mxu2 %v457_v6  ;;  %463 = vmatpush.bf16.msra.mxu3 %v457_v6  ;;  %v615_v6 = vld [vmem:[%s688_s2] ss:$0 sm:$0xff] }
   0xe   :  { %vm317_vm2 = vcmp.eq.s32.totalorder %v609_v0, %v615_v6 }
  0x10   :  { %136 = vmatpush.bf16.msra.mxu0 %v456_v7  ;;  %464 = vmatpush.bf16.msra.mxu1 %v456_v7 }
  0x11   :  { %465 = vmatpush.bf16.msra.mxu2 %v456_v7  ;;  %466 = vmatpush.bf16.msra.mxu3 %v456_v7 }
  0x13   :  { %440 = vmatmul.msk.bf16.vlgmr.msra.gmra.mxu0 %vm98_vm1, %v448_v8  ;;  %442 = vmatmul.msk.bf16.vlgmr.msra.gmra.mxu1 %vm98_vm1, %v450_v9  ;;  %v283_v9 = vadd.s32 8, %v609_v0 }
  0x14   :  { %444 = vmatmul.msk.bf16.vlgmr.msra.gmra.mxu2 %vm98_vm1, %v452_v10  ;;  %446 = vmatmul.msk.bf16.vlgmr.msra.gmra.mxu3 %vm98_vm1, %v454_v11  ;;  %v284_v10 = vadd.s32 16, %v609_v0 }
  0x15   :  { %vm318_vm3 = vcmp.eq.s32.totalorder %v283_v9, %v615_v6 }
  0x16   :  { %vm319_vm4 = vcmp.eq.s32.totalorder %v284_v10, %v615_v6 }
  0x23   :  { %441 = vmatmul.msk.bf16.gmra.mxu0 %vm98_vm1, %v449_v12  ;;  %443 = vmatmul.msk.bf16.gmra.mxu1 %vm98_vm1, %v451_v13  ;;  %v285_v13 = vadd.s32 24, %v609_v0 }
  0x24   :  { %445 = vmatmul.msk.bf16.gmra.mxu2 %vm98_vm1, %v453_v14  ;;  %447 = vmatmul.msk.bf16.gmra.mxu3 %vm98_vm1, %v455_v15 }
  0x25   :  { %vm320_vm5 = vcmp.eq.s32.totalorder %v285_v13, %v615_v6 }
  0x90   :  { %v138_v16 = vpop.f32.mrf.mxu0  ;;  %v148_v17 = vpop.f32.mrf.mxu1 }
  0x91   :  { %v179_v30 = vmax.f32 %v138_v16, %v148_v17 }
  0x97   :  { %v571_v20 = vpop.f32.mrf.mxu2  ;;  %v573_v21 = vpop.f32.mrf.mxu3 }
  0x98   :  { %v140_v22 = vpop.f32.mrf.mxu0  ;;  %v150_v23 = vpop.f32.mrf.mxu1  ;;  %v183_v36 = vmax.f32 %v179_v30, %v571_v20 }
  0x99   :  { %v180_v31 = vmax.f32 %v140_v22, %v150_v23 }
  0x9a   :  { %v187_v43 = vmax.f32 %v183_v36, %v573_v21 }
  0x9f   :  { %v575_v24 = vpop.f32.mrf.mxu2  ;;  %v577_v25 = vpop.f32.mrf.mxu3 }
  0xa0   :  { %v143_v26 = vpop.f32.mrf.mxu0  ;;  %v153_v27 = vpop.f32.mrf.mxu1  ;;  %v184_v35 = vmax.f32 %v180_v31, %v575_v24 }
  0xa1   :  { %v181_v32 = vmax.f32 %v143_v26, %v153_v27 }
  0xa2   :  { %v188_v40 = vmax.f32 %v184_v35, %v577_v25 }
  0xa4   :  { %v191_v46 = vmax.f32 %v187_v43, %v188_v40 }
  0xa7   :  { %v579_v28 = vpop.f32.mrf.mxu2  ;;  %v581_v29 = vpop.f32.mrf.mxu3 }
  0xa8   :  { %v145_v33 = vpop.f32.mrf.mxu0  ;;  %v155_v34 = vpop.f32.mrf.mxu1  ;;  %v185_v37 = vmax.f32 %v181_v32, %v579_v28 }
  0xa9   :  { %v182_v38 = vmax.f32 %v145_v33, %v155_v34 }
  0xaa   :  { %v189_v44 = vmax.f32 %v185_v37, %v581_v29 }
  0xaf   :  { %v586_v39 = vpop.f32.mrf.mxu2  ;;  %v590_v42 = vpop.f32.mrf.mxu3 }
  0xb0   :  { %v186_v41 = vmax.f32 %v182_v38, %v586_v39 }
  0xb2   :  { %v190_v45 = vmax.f32 %v186_v41, %v590_v42 }
  0xb4   :  { %v192_v47 = vmax.f32 %v189_v44, %v190_v45 }
  0xb6   :  { %v193_v48 = vmax.f32 %v191_v46, %v192_v47 }
  0xb8   :  { %v194_v49 = vrot.slane %v193_v48, 4 }
  0xba   :  { %v195_v50 = vmax.f32 %v193_v48, %v194_v49 }
  0xbc   :  { %v196_v51 = vrot.slane %v195_v50, 2 }
  0xbe   :  { %v197_v52 = vmax.f32 %v195_v50, %v196_v51 }
  0xc0   :  { %v198_v53 = vrot.slane %v197_v52, 1 }
  0xc2   :  { %v199_v55 = vmax.f32 %v197_v52, %v198_v53 }
  0xc4   :  { %v598_v56 = vmax.f32 %v595_v54, %v199_v55 }
  0xc6   :  { %v601_v57 = vperm.slane %v598_v56, 0  ;;  %374 = vst [vmem:[#allocation2] sm:$0x1] %v598_v56 }
  0xc8   :  { %v207_v59 = vsub.f32 %v138_v16, %v601_v57  ;;  %v208_v60 = vsub.f32 %v140_v22, %v601_v57  ;;  %v209_v61 = vsub.f32 %v143_v26, %v601_v57  ;;  %v210_v62 = vsub.f32 %v145_v33, %v601_v57 }
  0xc9   :  { %v211_v63 = vsub.f32 %v148_v17, %v601_v57  ;;  %v212_v3 = vsub.f32 %v150_v23, %v601_v57  ;;  %v213_v7 = vsub.f32 %v153_v27, %v601_v57  ;;  %v214_v11 = vsub.f32 %v155_v34, %v601_v57 }
  0xca   :  { %v223_v1 = vmul.f32 1.442695, %v207_v59  ;;  %v225_v2 = vmul.f32 1.442695, %v208_v60  ;;  %v227_v4 = vmul.f32 1.442695, %v209_v61  ;;  %v215_v14 = vsub.f32 %v571_v20, %v601_v57 }
  0xcb   :  { %v229_v5 = vmul.f32 1.442695, %v210_v62  ;;  %v231_v8 = vmul.f32 1.442695, %v211_v63  ;;  %v233_v12 = vmul.f32 1.442695, %v212_v3  ;;  %v216_v19 = vsub.f32 %v575_v24, %v601_v57 }
  0xcc   :  { %471 = vpow2.f32 %v223_v1  ;;  %v235_v15 = vmul.f32 1.442695, %v213_v7  ;;  %v286_v17 = vadd.s32 32, %v609_v0  ;;  %v237_v22 = vmul.f32 1.442695, %v214_v11 }
  0xcd   :  { %473 = vpow2.f32 %v225_v2  ;;  %v287_v20 = vadd.s32 40, %v609_v0  ;;  %v217_v32 = vsub.f32 %v579_v28, %v601_v57  ;;  %v239_v33 = vmul.f32 1.442695, %v215_v14 }
  0xce   :  { %475 = vpow2.f32 %v227_v4  ;;  %v288_v24 = vadd.s32 48, %v609_v0  ;;  %vm321_vm6 = vcmp.eq.s32.totalorder %v286_v17, %v615_v6  ;;  %v218_v38 = vsub.f32 %v586_v39, %v601_v57 }
  0xcf   :  { %477 = vpow2.f32 %v229_v5  ;;  %v241_v40 = vmul.f32 1.442695, %v216_v19  ;;  %v289_v28 = vadd.s32 56, %v609_v0  ;;  %vm322_vm7 = vcmp.eq.s32.totalorder %v287_v20, %v615_v6 }
  0xd0   :  { %479 = vpow2.f32 %v231_v8  ;;  %v219_v46 = vsub.f32 %v573_v21, %v601_v57  ;;  %v243_v47 = vmul.f32 1.442695, %v217_v32  ;;  %v290_v39 = vadd.s32 64, %v609_v0 }
  0xd1   :  { %481 = vpow2.f32 %v233_v12  ;;  %vm323_vm8 = vcmp.eq.s32.totalorder %v288_v24, %v615_v6  ;;  %v220_v52 = vsub.f32 %v577_v25, %v601_v57  ;;  %v245_v53 = vmul.f32 1.442695, %v218_v38 }
  0xd2   :  { %v472_v16 = vpop.eup %471  ;;  %483 = vpow2.f32 %v235_v15  ;;  %v291_v21 = vadd.s32 72, %v609_v0  ;;  %vm324_vm9 = vcmp.eq.s32.totalorder %v289_v28, %v615_v6  ;;  %v221_v61 = vsub.f32 %v581_v29, %v601_v57 }
  0xd3   :  { %v474_v18 = vpop.eup %473  ;;  %v335_v23 = vsel %vm317_vm2, %v472_v16, 0.0  ;;  %485 = vpow2.f32 %v237_v22  ;;  %v247_v62 = vmul.f32 1.442695, %v219_v46  ;;  %v292_v25 = vadd.s32 80, %v609_v0 }
  0xd4   :  { %v476_v26 = vpop.eup %475  ;;  %v257_v27 = vadd.f32 %v474_v18, %v472_v16  ;;  %v336_v30 = vsel %vm318_vm3, %v474_v18, 0.0  ;;  %487 = vpow2.f32 %v239_v33  ;;  %vm325_vm10 = vcmp.eq.s32.totalorder %v290_v39, %v615_v6 }
  0xd5   :  { %v478_v31 = vpop.eup %477  ;;  %v351_v34 = vadd.f32 %v336_v30, %v335_v23  ;;  %v337_v36 = vsel %vm319_vm4, %v476_v26, 0.0  ;;  %489 = vpow2.f32 %v241_v40  ;;  %v222_v4 = vsub.f32 %v590_v42, %v601_v57 }
  0xd6   :  { %v258_v35 = vadd.f32 %v476_v26, %v257_v27  ;;  %v480_v37 = vpop.eup %479  ;;  %v338_v44 = vsel %vm320_vm5, %v478_v31, 0.0  ;;  %491 = vpow2.f32 %v243_v47  ;;  %v249_v5 = vmul.f32 1.442695, %v220_v52 }
  0xd7   :  { %v352_v41 = vadd.f32 %v351_v34, %v337_v36  ;;  %v482_v45 = vpop.eup %481  ;;  %v339_v50 = vsel %vm321_vm6, %v480_v37, 0.0  ;;  %493 = vpow2.f32 %v245_v53  ;;  %v293_v29 = vadd.s32 88, %v609_v0 }
  0xd8   :  { %v259_v43 = vadd.f32 %v478_v31, %v258_v35  ;;  %v484_v51 = vpop.eup %483  ;;  %v340_v59 = vsel %vm322_vm7, %v482_v45, 0.0  ;;  %495 = vpow2.f32 %v247_v62  ;;  %v251_v11 = vmul.f32 1.442695, %v221_v61  ;;  %v333_v61 = vld [vmem:[#allocation4] sm:$0x1] }
  0xd9   :  { %v353_v48 = vadd.f32 %v352_v41, %v338_v44  ;;  %v486_v60 = vpop.eup %485  ;;  %v341_v2 = vsel %vm323_vm8, %v484_v51, 0.0  ;;  %vm326_vm11 = vcmp.eq.s32.totalorder %v291_v21, %v615_v6  ;;  %v294_v14 = vadd.s32 96, %v609_v0 }
  0xda   :  { %v260_v49 = vadd.f32 %v480_v37, %v259_v43  ;;  %v488_v3 = vpop.eup %487  ;;  %v342_v9 = vsel %vm324_vm9, %v486_v60, 0.0  ;;  %497 = vpow2.f32 %v249_v5  ;;  %v253_v15 = vmul.f32 1.442695, %v222_v4 }
  0xdb   :  { %v354_v55 = vadd.f32 %v353_v48, %v339_v50  ;;  %v490_v10 = vpop.eup %489  ;;  %v343_v42 = vsel %vm325_vm10, %v488_v3, 0.0  ;;  %vm327_vm12 = vcmp.eq.s32.totalorder %v292_v25, %v615_v6  ;;  %499 = vpow2.f32 %v251_v11 }
  0xdc   :  { %v261_v58 = vadd.f32 %v482_v45, %v260_v49  ;;  %v492_v57 = vpop.eup %491  ;;  %v344_v18 = vsel %vm326_vm11, %v490_v10, 0.0  ;;  %v295_v22 = vadd.s32 104, %v609_v0  ;;  %vm328_vm13 = vcmp.eq.s32.totalorder %v293_v29, %v615_v6 }
  0xdd   :  { %v355_v63 = vadd.f32 %v354_v55, %v340_v59  ;;  %v494_v19 = vpop.eup %493  ;;  %v345_v27 = vsel %vm327_vm12, %v492_v57, 0.0  ;;  %501 = vpow2.f32 %v253_v15  ;;  %v296_v30 = vadd.s32 112, %v609_v0  ;;  %v255_v59 = vld [vmem:[#allocation3] sm:$0x1] }
  0xde   :  { %v262_v1 = vadd.f32 %v484_v51, %v261_v58  ;;  %v496_v20 = vpop.eup %495  ;;  %vm329_vm14 = vcmp.eq.s32.totalorder %v294_v14, %v615_v6  ;;  %v346_v33 = vsel %vm328_vm13, %v494_v19, 0.0  ;;  %v297_v35 = vadd.s32 120, %v609_v0 }
  0xdf   :  { %v356_v7 = vadd.f32 %v355_v63, %v341_v2  ;;  %vm330_vm15 = vcmp.eq.s32.totalorder %v295_v22, %v615_v6  ;;  %v347_v37 = vsel %vm329_vm14, %v496_v20, 0.0  ;;  %v201_v40 = vsub.f32 %v595_v54, %v598_v56 }
  0xe0   :  { %v263_v8 = vadd.f32 %v486_v60, %v262_v1  ;;  %v498_v34 = vpop.eup %497  ;;  %vm331_vm0 = vcmp.eq.s32.totalorder %v296_v30, %v615_v6  ;;  %vm332_vm1 = vcmp.eq.s32.totalorder %v297_v35, %v615_v6 }
  0xe1   :  { %v357_v12 = vadd.f32 %v356_v7, %v342_v9  ;;  %v500_v38 = vpop.eup %499  ;;  %v348_v28 = vsel %vm330_vm15, %v498_v34, 0.0  ;;  %v202_v47 = vmul.f32 1.442695, %v201_v40 }
  0xe2   :  { %v264_v13 = vadd.f32 %v488_v3, %v263_v8  ;;  %v349_v0 = vsel %vm331_vm0, %v500_v38, 0.0 }
  0xe3   :  { %v358_v16 = vadd.f32 %v357_v12, %v343_v42  ;;  %v502_v44 = vpop.eup %501  ;;  %503 = vpow2.f32 %v202_v47 }
  0xe4   :  { %v265_v17 = vadd.f32 %v490_v10, %v264_v13  ;;  %v350_v39 = vsel %vm332_vm1, %v502_v44, 0.0 }
  0xe5   :  { %v359_v23 = vadd.f32 %v358_v16, %v344_v18 }
  0xe6   :  { %v266_v26 = vadd.f32 %v492_v57, %v265_v17 }
  0xe7   :  { %v360_v31 = vadd.f32 %v359_v23, %v345_v27 }
  0xe8   :  { %v267_v32 = vadd.f32 %v494_v19, %v266_v26 }
  0xe9   :  { %v361_v24 = vadd.f32 %v360_v31, %v346_v33  ;;  %v504_v21 = vpop.eup %503 }
  0xea   :  { %v268_v36 = vadd.f32 %v496_v20, %v267_v32  ;;  %v256_v63 = vmul.f32 %v504_v21, %v255_v59  ;;  %v334_v25 = vmul.f32 %v504_v21, %v333_v61 }
  0xeb   :  { %v362_v41 = vadd.f32 %v361_v24, %v347_v37 }
  0xec   :  { %v269_v43 = vadd.f32 %v498_v34, %v268_v36 }
  0xed   :  { %v363_v45 = vadd.f32 %v362_v41, %v348_v28 }
  0xee   :  { %v270_v46 = vadd.f32 %v500_v38, %v269_v43 }
  0xef   :  { %v364_v48 = vadd.f32 %v363_v45, %v349_v0 }
  0xf0   :  { %v271_v49 = vadd.f32 %v502_v44, %v270_v46 }
  0xf1   :  { %v365_v50 = vadd.f32 %v364_v48, %v350_v39 }
  0xf2   :  { %v272_v51 = vrot.slane %v271_v49, 4 }
  0xf3   :  { %v366_v52 = vrot.slane %v365_v50, 4 }
  0xf4   :  { %v273_v54 = vadd.f32 %v272_v51, %v271_v49 }
  0xf5   :  { %v367_v56 = vadd.f32 %v366_v52, %v365_v50 }
  0xf6   :  { %v274_v53 = vrot.slane %v273_v54, 2 }
  0xf7   :  { %v368_v55 = vrot.slane %v367_v56, 2 }
  0xf8   :  { %v275_v58 = vadd.f32 %v274_v53, %v273_v54 }
  0xf9   :  { %v369_v60 = vadd.f32 %v368_v55, %v367_v56 }
  0xfa   :  { %v276_v6 = vrot.slane %v275_v58, 1 }
  0xfb   :  { %v370_v62 = vrot.slane %v369_v60, 1 }
  0xfc   :  { %v277_v1 = vadd.f32 %v276_v6, %v275_v58 }
  0xfd   :  { %v371_v2 = vadd.f32 %v370_v62, %v369_v60 }
  0xfe   :  { %v278_v3 = vadd.f32 %v277_v1, %v256_v63 }
  0xff   :  { %v372_v4 = vadd.f32 %v371_v2, %v334_v25 }
 0x100   :  { %279 = vst [vmem:[#allocation3] sm:$0x1] %v278_v3 }
 0x101   :  { %373 = vst [vmem:[#allocation4] sm:$0x1] %v372_v4 }
 0x107   :  { %v379_v5 = vld [vmem:[#allocation3] sm:$0x1] }
 0x108   :  { %505 = vrcp.f32 %v379_v5  ;;  %v391_v9 = vand.u32 2147483648, %v379_v5  ;;  %v389_v11 = vand.u32 2147483647, %v379_v5  ;;  %vm385_vm3 = vweird.f32 %v379_v5  ;;  %v378_v42 = vld [vmem:[#allocation4] sm:$0x1] }
 0x10a   :  { %v392_v13 = vor.u32 1.1754944e-38, %v391_v9  ;;  %vm390_vm5 = vcmp.eq.f32.partialorder %v389_v11, 8.507059e+37 }
 0x10e   :  { %v506_v7 = vpop.eup %505 }
 0x10f   :  { %v381_v8 = vmul.f32 %v506_v7, %v379_v5  ;;  %vm386_vm2 = vweird.f32 %v506_v7 }
 0x110   :  { %vm387_vm4 = vmor %vm385_vm3, %vm386_vm2 }
 0x111   :  { %v382_v29 = vsub.f32 1.0, %v381_v8 }
 0x113   :  { %v383_v10 = vmul.f32 %v506_v7, %v382_v29 }
 0x115   :  { %v384_v12 = vadd.f32 %v506_v7, %v383_v10 }
 0x117   :  { %v388_v14 = vsel %vm387_vm4, %v506_v7, %v384_v12 }
 0x118   :  { %v393_v57 = vsel %vm390_vm5, %v392_v13, %v388_v14 }
 0x119   :  { %v394_v15 = vmul.f32 %v393_v57, %v378_v42 }
 0x11b   :  { %395 = vst [vmem:[%s689_s3] sm:$0x1] %v394_v15 }

</bundles_post_ra>
